<compile_context>
chip_gen: v7x
topology: tpu7x:2x2x1
jax: 0.10.0
libtpu: 0.0.40
codegen_flags: <defaults>
</compile_context>

<pallas_src>
import functools

import numpy as np
import jax
import jax.numpy as jnp
from jax import lax
from jax.experimental import pallas as pl
from jax.experimental.pallas import tpu as pltpu

W_EDGE = 1.0 / 6.0     # axis-neighbour weight
W_CORNER = 1.0 / 12.0  # diagonal-neighbour weight


def _roll(x, shift, axis):
    """pltpu.roll with a non-negative shift (jnp.roll semantics)."""
    size = x.shape[axis]
    return pltpu.roll(x, shift % size, axis)


def _road_impute_kernel(img_ref, mask_ref, noise_ref, colmask_ref, out_ref, *,
                        noise_level, num_iters, unroll):
    """Noisy linear imputation for one lane-packed block.

    img_ref:     (H, L)  original pixels, L = NB * C * W (samples/channels in lanes)
    mask_ref:    (H, L)  binary mask, 0 = pixel to impute, 1 = keep
    noise_ref:   (H, L)  standard normal noise
    colmask_ref: (2, L)  [has_left_neighbour, has_right_neighbour] per lane
    out_ref:     (H, L)  imputed pixels
    """
    H, L = img_ref.shape
    img = img_ref[...].astype(jnp.float32)
    maskf = mask_ref[...].astype(jnp.float32)

    # ---- loop-invariant precomputation (everything hoisted out of the Jacobi loop) ----
    unk = 1.0 - maskf            # 1 at pixels to impute
    img_known = img * maskf      # known pixels clamped, 0 elsewhere

    # Border-validity masks.  Rows: in-kernel iota compare.  Columns (repeat every W
    # lanes across channel/sample segments): host precomputed; broadcast materialized
    # once so no per-iteration broadcast_in_dim is emitted.
    cm = colmask_ref[...]                                            # (2, L)
    has_left = jnp.broadcast_to(cm[0:1, :], (H, L))
    has_right = jnp.broadcast_to(cm[1:2, :], (H, L))
    row_idx = lax.broadcasted_iota(jnp.int32, (H, L), 0)
    # Pre-scale the row masks by the corner weight (saves one mul per sweep).
    w_up = jnp.where(row_idx > 0, W_CORNER, 0.0).astype(jnp.float32)
    w_down = jnp.where(row_idx < H - 1, W_CORNER, 0.0).astype(jnp.float32)

    def stencil(f):
        # Weighted 8-neighbour sum with zero contribution outside the image segment.
        # 4 XLU rolls + ~11 VPU ops:
        #   g      = 1/12*(f[r-1,c] + f[r+1,c])                 (border-masked)
        #   rowsum = g + 1/6*f[r,c]
        #   out    = rowsum[c-1] + rowsum[c+1] + 2*g             (border-masked)
        g = w_up * _roll(f, 1, 0) + w_down * _roll(f, -1, 0)
        rowsum = g + W_EDGE * f
        left = has_left * _roll(rowsum, 1, 1)     # rowsum[:, c-1]
        right = has_right * _roll(rowsum, -1, 1)  # rowsum[:, c+1]
        return left + right + 2.0 * g

    # Total weight of in-bounds neighbours == diag of -A in the reference sparse system.
    sum_w = stencil(jnp.ones((H, L), jnp.float32))
    inv_sw = pl.reciprocal(sum_w, approx=True)
    inv_sw = inv_sw * (2.0 - sum_w * inv_sw)   # one Newton step -> full f32 accuracy
    gain = unk * inv_sw                        # 0 at known pixels, 1/sum_w at unknowns

    def one_update(f):
        # Jacobi update of A x = b; known pixels stay clamped to the original image.
        return img_known + gain * stencil(f)

    steps = num_iters // unroll
    rem = num_iters - steps * unroll

    def body(_, f):
        for _u in range(unroll):               # partial unroll -> ILP for the scheduler
            f = one_update(f)
        return f

    f = lax.fori_loop(0, steps, body, img_known)   # iterate carried in registers
    for _ in range(rem):
        f = one_update(f)

    # Gaussian noise only at the imputed pixels (f already equals img at known pixels).
    out = f + (noise_level * unk) * noise_ref[...].astype(jnp.float32)
    out_ref[...] = out.astype(out_ref.dtype)


def _choose_samples_per_block(C, W, N):
    """Samples packed per block so lanes >= 128, preferring lane widths % 128 == 0."""
    cw = C * W
    nb = max(1, -(-128 // cw))                       # minimal count to reach 128 lanes
    if (nb * cw) % 128 != 0:
        # Bump to a full-vreg lane width only if it doesn't add padded samples beyond N.
        for cand in range(nb + 1, min(4 * nb, max(nb, N)) + 1):
            if (cand * cw) % 128 == 0:
                return cand
    return nb


def road_impute(img, mask, noise_arr, *, noise=0.01, num_iters=512, unroll=4):
    """img: (N, C, H, W) f32; mask: (N, H, W) f32 (0 = impute); noise_arr: (N, C, H, W)."""
    N, C, H, W = img.shape

    # Pack samples/channels along the lane axis so the last dim is >= 128 when possible.
    nb = _choose_samples_per_block(C, W, N)
    n_pad = -(-N // nb) * nb
    ng = n_pad // nb
    lanes = nb * C * W

    out_dtype = img.dtype
    if n_pad != N:
        pad = n_pad - N
        img = jnp.pad(img, ((0, pad), (0, 0), (0, 0), (0, 0)))
        noise_arr = jnp.pad(noise_arr, ((0, pad), (0, 0), (0, 0), (0, 0)))
        mask = jnp.pad(mask, ((0, pad), (0, 0), (0, 0)), constant_values=1.0)

    def pack_img(x):
        x = x.reshape(ng, nb, C, H, W)
        x = jnp.transpose(x, (0, 3, 1, 2, 4))          # (ng, H, nb, C, W)
        return x.reshape(ng, H, lanes)

    img_p = pack_img(img.astype(jnp.float32))
    noise_p = pack_img(noise_arr.astype(jnp.float32))

    m = mask.astype(jnp.float32).reshape(ng, nb, H, W)
    m = jnp.transpose(m, (0, 2, 1, 3))[:, :, :, None, :]           # (ng, H, nb, 1, W)
    mask_p = jnp.broadcast_to(m, (ng, H, nb, C, W)).reshape(ng, H, lanes)

    # Column border masks per lane (0 at segment boundaries -> no cross-image leakage).
    cols = np.arange(W)
    has_left_1d = (cols > 0).astype(np.float32)
    has_right_1d = (cols < W - 1).astype(np.float32)
    col_masks = jnp.asarray(
        np.stack([np.tile(has_left_1d, nb * C), np.tile(has_right_1d, nb * C)]))  # (2, lanes)

    kernel = functools.partial(_road_impute_kernel,
                               noise_level=float(noise),
                               num_iters=int(num_iters), unroll=int(unroll))

    out_p = pl.pallas_call(
        kernel,
        out_shape=jax.ShapeDtypeStruct((ng, H, lanes), out_dtype),
        grid_spec=pltpu.PrefetchScalarGridSpec(
            num_scalar_prefetch=0,
            grid=(ng,),
            in_specs=[
                pl.BlockSpec((None, H, lanes), lambda g: (g, 0, 0)),  # packed image
                pl.BlockSpec((None, H, lanes), lambda g: (g, 0, 0)),  # packed mask
                pl.BlockSpec((None, H, lanes), lambda g: (g, 0, 0)),  # packed noise
                pl.BlockSpec((2, lanes), lambda g: (0, 0)),           # column border masks
            ],
            out_specs=pl.BlockSpec((None, H, lanes), lambda g: (g, 0, 0)),
        ),
        compiler_params=pltpu.CompilerParams(
            dimension_semantics=("parallel",)),  # batch axis: shard across TCs on v7x
    )(img_p, mask_p, noise_p, col_masks)

    out = out_p.reshape(ng, H, nb, C, W)
    out = jnp.transpose(out, (0, 2, 3, 1, 4)).reshape(n_pad, C, H, W)
    return out[:N]


def get_road_mask_by_area(smap, mask_ratio, smap_mask_mode="morf"):
    """smap: (N, H, W) uint8. Returns float32 mask (N, H, W); 0 = pixel to impute.

    MoRF masks the top `mask_ratio` fraction of pixels by saliency value; LeRF masks
    the bottom fraction.
    """
    # TODO(synk): per-image sort / top-k selection stays in JAX glue (no clean Pallas sort).
    N, H, W = smap.shape
    num = H * W
    k = int(round(float(mask_ratio) * num))
    flat = smap.reshape(N, num).astype(jnp.float32)
    keys = -flat if smap_mask_mode == "morf" else flat
    order = jnp.argsort(keys, axis=-1)          # pixels to mask come first
    ranks = jnp.argsort(order, axis=-1)
    mask = (ranks >= k).astype(jnp.float32)     # 0 = impute, 1 = keep
    return mask.reshape(N, H, W)


def road_forward(img, smap, *, mask_ratio, noise=0.01, smap_mask_mode="morf",
                 by_area=True, num_iters=512, rng_key=None):
    """Equivalent of ROAD.forward: returns {'imputed_img': (N,C,H,W), 'mask': (N,H,W)}."""
    if mask_ratio is None:
        raise ValueError("ROAD mask_ratio is not set yet.")
    if not by_area:
        # TODO(synk): by-value thresholding variant not exercised here (default path is by_area).
        raise NotImplementedError("only by_area=True path is implemented")
    mask = get_road_mask_by_area(smap, mask_ratio, smap_mask_mode=smap_mask_mode)
    if rng_key is None:
        rng_key = jax.random.PRNGKey(0)
    noise_arr = jax.random.normal(rng_key, img.shape, dtype=jnp.float32)
    imputed = road_impute(img, mask, noise_arr, noise=noise, num_iters=num_iters)
    return {"imputed_img": imputed, "mask": mask}


if __name__ == "__main__":
    key = jax.random.PRNGKey(0)
    k_img, k_smap, k_noise = jax.random.split(key, 3)

    N, C, H, W = 2, 4, 16, 16
    img = jax.random.normal(k_img, (N, C, H, W), dtype=jnp.float32)
    smap = jax.random.randint(k_smap, (N, H, W), 0, 256, dtype=jnp.int32).astype(jnp.uint8)

    result = road_forward(img, smap, mask_ratio=0.25, noise=0.01,
                          smap_mask_mode="morf", by_area=True,
                          num_iters=512, rng_key=k_noise)

    jax.block_until_ready(result["imputed_img"])
    jax.block_until_ready(result["mask"])
    print("KERNEL_OK")
</pallas_src>

<mosaic_0001>
module attributes {stable_mosaic.version = 11 : i64} {
  func.func @_road_impute_kernel(%arg0: i32, %arg1: memref<1x16x128xf32, #tpu.memory_space<vmem>>, %arg2: memref<1x16x128xf32, #tpu.memory_space<vmem>>, %arg3: memref<1x16x128xf32, #tpu.memory_space<vmem>>, %arg4: memref<2x128xf32, #tpu.memory_space<vmem>>, %arg5: memref<1x16x128xf32, #tpu.memory_space<vmem>>) attributes {dimension_semantics = [#tpu.dimension_semantics<parallel>], iteration_bounds = array<i64: 1>, scalar_prefetch = 0 : i64, scratch_operands = 0 : i64, tpu.core_type = #tpu.core_type<tc>, window_params = [{transform_indices = @transform_0, window_bounds = array<i64: 1, 16, 128>}, {transform_indices = @transform_1, window_bounds = array<i64: 1, 16, 128>}, {transform_indices = @transform_2, window_bounds = array<i64: 1, 16, 128>}, {pipeline_mode = #tpu.pipeline_mode<synchronous>, transform_indices = @transform_3, window_bounds = array<i64: 2, 128>}, {transform_indices = @transform_4, window_bounds = array<i64: 1, 16, 128>}]} {
    %c0 = arith.constant 0 : index
    %c0_0 = arith.constant 0 : index
    %c0_1 = arith.constant 0 : index
    %0 = vector.load %arg1[%c0, %c0_0, %c0_1] : memref<1x16x128xf32, #tpu.memory_space<vmem>>, vector<1x16x128xf32>
    %1 = vector.shape_cast %0 : vector<1x16x128xf32> to vector<16x128xf32>
    %c0_2 = arith.constant 0 : index
    %c0_3 = arith.constant 0 : index
    %c0_4 = arith.constant 0 : index
    %2 = vector.load %arg2[%c0_2, %c0_3, %c0_4] : memref<1x16x128xf32, #tpu.memory_space<vmem>>, vector<1x16x128xf32>
    %3 = vector.shape_cast %2 : vector<1x16x128xf32> to vector<16x128xf32>
    %cst = arith.constant 1.000000e+00 : f32
    %4 = vector.broadcast %cst : f32 to vector<16x128xf32>
    %5 = arith.subf %4, %3 : vector<16x128xf32>
    %6 = arith.mulf %1, %3 : vector<16x128xf32>
    %c0_5 = arith.constant 0 : index
    %c0_6 = arith.constant 0 : index
    %7 = vector.load %arg4[%c0_5, %c0_6] : memref<2x128xf32, #tpu.memory_space<vmem>>, vector<2x128xf32>
    %8 = vector.extract_strided_slice %7 {offsets = [0, 0], sizes = [1, 128], strides = [1, 1]} : vector<2x128xf32> to vector<1x128xf32>
    %9 = vector.shape_cast %8 : vector<1x128xf32> to vector<1x128xf32>
    %10 = vector.broadcast %9 : vector<1x128xf32> to vector<16x128xf32>
    %11 = vector.extract_strided_slice %7 {offsets = [1, 0], sizes = [1, 128], strides = [1, 1]} : vector<2x128xf32> to vector<1x128xf32>
    %12 = vector.shape_cast %11 : vector<1x128xf32> to vector<1x128xf32>
    %13 = vector.broadcast %12 : vector<1x128xf32> to vector<16x128xf32>
    %14 = tpu.iota {dimensions = array<i32: 0>} : vector<16x128xi32>
    %c0_i32 = arith.constant 0 : i32
    %15 = vector.broadcast %c0_i32 : i32 to vector<16x128xi32>
    %16 = arith.cmpi sgt, %14, %15 : vector<16x128xi32>
    %cst_7 = arith.constant 0.0833333358 : f32
    %cst_8 = arith.constant 0.000000e+00 : f32
    %17 = vector.broadcast %cst_7 : f32 to vector<16x128xf32>
    %18 = vector.broadcast %cst_8 : f32 to vector<16x128xf32>
    %19 = arith.select %16, %17, %18 : vector<16x128xi1>, vector<16x128xf32>
    %c15_i32 = arith.constant 15 : i32
    %20 = vector.broadcast %c15_i32 : i32 to vector<16x128xi32>
    %21 = arith.cmpi slt, %14, %20 : vector<16x128xi32>
    %cst_9 = arith.constant 0.0833333358 : f32
    %cst_10 = arith.constant 0.000000e+00 : f32
    %22 = vector.broadcast %cst_9 : f32 to vector<16x128xf32>
    %23 = vector.broadcast %cst_10 : f32 to vector<16x128xf32>
    %24 = arith.select %21, %22, %23 : vector<16x128xi1>, vector<16x128xf32>
    %cst_11 = arith.constant 1.000000e+00 : f32
    %25 = vector.broadcast %cst_11 : f32 to vector<16x128xf32>
    %c1_i32 = arith.constant 1 : i32
    %26 = tpu.dynamic_rotate %25 by %c1_i32 dim 0 : vector<16x128xf32>, i32 -> vector<16x128xf32>
    %27 = arith.mulf %19, %26 : vector<16x128xf32>
    %c15_i32_12 = arith.constant 15 : i32
    %28 = tpu.dynamic_rotate %25 by %c15_i32_12 dim 0 : vector<16x128xf32>, i32 -> vector<16x128xf32>
    %29 = arith.mulf %24, %28 : vector<16x128xf32>
    %30 = arith.addf %27, %29 : vector<16x128xf32>
    %cst_13 = arith.constant 0.166666672 : f32
    %31 = vector.broadcast %cst_13 : f32 to vector<16x128xf32>
    %32 = arith.mulf %31, %25 : vector<16x128xf32>
    %33 = arith.addf %30, %32 : vector<16x128xf32>
    %c1_i32_14 = arith.constant 1 : i32
    %34 = tpu.dynamic_rotate %33 by %c1_i32_14 dim 1 : vector<16x128xf32>, i32 -> vector<16x128xf32>
    %35 = arith.mulf %10, %34 : vector<16x128xf32>
    %c127_i32 = arith.constant 127 : i32
    %36 = tpu.dynamic_rotate %33 by %c127_i32 dim 1 : vector<16x128xf32>, i32 -> vector<16x128xf32>
    %37 = arith.mulf %13, %36 : vector<16x128xf32>
    %38 = arith.addf %35, %37 : vector<16x128xf32>
    %cst_15 = arith.constant 2.000000e+00 : f32
    %39 = vector.broadcast %cst_15 : f32 to vector<16x128xf32>
    %40 = arith.mulf %39, %30 : vector<16x128xf32>
    %41 = arith.addf %38, %40 : vector<16x128xf32>
    %42 = tpu.reciprocal %41 {approx = true} : vector<16x128xf32> -> vector<16x128xf32>
    %43 = arith.mulf %41, %42 : vector<16x128xf32>
    %cst_16 = arith.constant 2.000000e+00 : f32
    %44 = vector.broadcast %cst_16 : f32 to vector<16x128xf32>
    %45 = arith.subf %44, %43 : vector<16x128xf32>
    %46 = arith.mulf %42, %45 : vector<16x128xf32>
    %47 = arith.mulf %5, %46 : vector<16x128xf32>
    %c0_i32_17 = arith.constant 0 : i32
    %c128_i32 = arith.constant 128 : i32
    %48 = arith.addi %c0_i32_17, %c128_i32 : i32
    %c1_i32_18 = arith.constant 1 : i32
    %49 = scf.for %arg6 = %c0_i32_17 to %48 step %c1_i32_18 iter_args(%arg7 = %6) -> (vector<16x128xf32>)  : i32 {
      %c1_i32_26 = arith.constant 1 : i32
      %59 = tpu.dynamic_rotate %arg7 by %c1_i32_26 dim 0 : vector<16x128xf32>, i32 -> vector<16x128xf32>
      %60 = arith.mulf %19, %59 : vector<16x128xf32>
      %c15_i32_27 = arith.constant 15 : i32
      %61 = tpu.dynamic_rotate %arg7 by %c15_i32_27 dim 0 : vector<16x128xf32>, i32 -> vector<16x128xf32>
      %62 = arith.mulf %24, %61 : vector<16x128xf32>
      %63 = arith.addf %60, %62 : vector<16x128xf32>
      %cst_28 = arith.constant 0.166666672 : f32
      %64 = vector.broadcast %cst_28 : f32 to vector<16x128xf32>
      %65 = arith.mulf %64, %arg7 : vector<16x128xf32>
      %66 = arith.addf %63, %65 : vector<16x128xf32>
      %c1_i32_29 = arith.constant 1 : i32
      %67 = tpu.dynamic_rotate %66 by %c1_i32_29 dim 1 : vector<16x128xf32>, i32 -> vector<16x128xf32>
      %68 = arith.mulf %10, %67 : vector<16x128xf32>
      %c127_i32_30 = arith.constant 127 : i32
      %69 = tpu.dynamic_rotate %66 by %c127_i32_30 dim 1 : vector<16x128xf32>, i32 -> vector<16x128xf32>
      %70 = arith.mulf %13, %69 : vector<16x128xf32>
      %71 = arith.addf %68, %70 : vector<16x128xf32>
      %cst_31 = arith.constant 2.000000e+00 : f32
      %72 = vector.broadcast %cst_31 : f32 to vector<16x128xf32>
      %73 = arith.mulf %72, %63 : vector<16x128xf32>
      %74 = arith.addf %71, %73 : vector<16x128xf32>
      %75 = arith.mulf %47, %74 : vector<16x128xf32>
      %76 = arith.addf %6, %75 : vector<16x128xf32>
      %c1_i32_32 = arith.constant 1 : i32
      %77 = tpu.dynamic_rotate %76 by %c1_i32_32 dim 0 : vector<16x128xf32>, i32 -> vector<16x128xf32>
      %78 = arith.mulf %19, %77 : vector<16x128xf32>
      %c15_i32_33 = arith.constant 15 : i32
      %79 = tpu.dynamic_rotate %76 by %c15_i32_33 dim 0 : vector<16x128xf32>, i32 -> vector<16x128xf32>
      %80 = arith.mulf %24, %79 : vector<16x128xf32>
      %81 = arith.addf %78, %80 : vector<16x128xf32>
      %cst_34 = arith.constant 0.166666672 : f32
      %82 = vector.broadcast %cst_34 : f32 to vector<16x128xf32>
      %83 = arith.mulf %82, %76 : vector<16x128xf32>
      %84 = arith.addf %81, %83 : vector<16x128xf32>
      %c1_i32_35 = arith.constant 1 : i32
      %85 = tpu.dynamic_rotate %84 by %c1_i32_35 dim 1 : vector<16x128xf32>, i32 -> vector<16x128xf32>
      %86 = arith.mulf %10, %85 : vector<16x128xf32>
      %c127_i32_36 = arith.constant 127 : i32
      %87 = tpu.dynamic_rotate %84 by %c127_i32_36 dim 1 : vector<16x128xf32>, i32 -> vector<16x128xf32>
      %88 = arith.mulf %13, %87 : vector<16x128xf32>
      %89 = arith.addf %86, %88 : vector<16x128xf32>
      %cst_37 = arith.constant 2.000000e+00 : f32
      %90 = vector.broadcast %cst_37 : f32 to vector<16x128xf32>
      %91 = arith.mulf %90, %81 : vector<16x128xf32>
      %92 = arith.addf %89, %91 : vector<16x128xf32>
      %93 = arith.mulf %47, %92 : vector<16x128xf32>
      %94 = arith.addf %6, %93 : vector<16x128xf32>
      %c1_i32_38 = arith.constant 1 : i32
      %95 = tpu.dynamic_rotate %94 by %c1_i32_38 dim 0 : vector<16x128xf32>, i32 -> vector<16x128xf32>
      %96 = arith.mulf %19, %95 : vector<16x128xf32>
      %c15_i32_39 = arith.constant 15 : i32
      %97 = tpu.dynamic_rotate %94 by %c15_i32_39 dim 0 : vector<16x128xf32>, i32 -> vector<16x128xf32>
      %98 = arith.mulf %24, %97 : vector<16x128xf32>
      %99 = arith.addf %96, %98 : vector<16x128xf32>
      %cst_40 = arith.constant 0.166666672 : f32
      %100 = vector.broadcast %cst_40 : f32 to vector<16x128xf32>
      %101 = arith.mulf %100, %94 : vector<16x128xf32>
      %102 = arith.addf %99, %101 : vector<16x128xf32>
      %c1_i32_41 = arith.constant 1 : i32
      %103 = tpu.dynamic_rotate %102 by %c1_i32_41 dim 1 : vector<16x128xf32>, i32 -> vector<16x128xf32>
      %104 = arith.mulf %10, %103 : vector<16x128xf32>
      %c127_i32_42 = arith.constant 127 : i32
      %105 = tpu.dynamic_rotate %102 by %c127_i32_42 dim 1 : vector<16x128xf32>, i32 -> vector<16x128xf32>
      %106 = arith.mulf %13, %105 : vector<16x128xf32>
      %107 = arith.addf %104, %106 : vector<16x128xf32>
      %cst_43 = arith.constant 2.000000e+00 : f32
      %108 = vector.broadcast %cst_43 : f32 to vector<16x128xf32>
      %109 = arith.mulf %108, %99 : vector<16x128xf32>
      %110 = arith.addf %107, %109 : vector<16x128xf32>
      %111 = arith.mulf %47, %110 : vector<16x128xf32>
      %112 = arith.addf %6, %111 : vector<16x128xf32>
      %c1_i32_44 = arith.constant 1 : i32
      %113 = tpu.dynamic_rotate %112 by %c1_i32_44 dim 0 : vector<16x128xf32>, i32 -> vector<16x128xf32>
      %114 = arith.mulf %19, %113 : vector<16x128xf32>
      %c15_i32_45 = arith.constant 15 : i32
      %115 = tpu.dynamic_rotate %112 by %c15_i32_45 dim 0 : vector<16x128xf32>, i32 -> vector<16x128xf32>
      %116 = arith.mulf %24, %115 : vector<16x128xf32>
      %117 = arith.addf %114, %116 : vector<16x128xf32>
      %cst_46 = arith.constant 0.166666672 : f32
      %118 = vector.broadcast %cst_46 : f32 to vector<16x128xf32>
      %119 = arith.mulf %118, %112 : vector<16x128xf32>
      %120 = arith.addf %117, %119 : vector<16x128xf32>
      %c1_i32_47 = arith.constant 1 : i32
      %121 = tpu.dynamic_rotate %120 by %c1_i32_47 dim 1 : vector<16x128xf32>, i32 -> vector<16x128xf32>
      %122 = arith.mulf %10, %121 : vector<16x128xf32>
      %c127_i32_48 = arith.constant 127 : i32
      %123 = tpu.dynamic_rotate %120 by %c127_i32_48 dim 1 : vector<16x128xf32>, i32 -> vector<16x128xf32>
      %124 = arith.mulf %13, %123 : vector<16x128xf32>
      %125 = arith.addf %122, %124 : vector<16x128xf32>
      %cst_49 = arith.constant 2.000000e+00 : f32
      %126 = vector.broadcast %cst_49 : f32 to vector<16x128xf32>
      %127 = arith.mulf %126, %117 : vector<16x128xf32>
      %128 = arith.addf %125, %127 : vector<16x128xf32>
      %129 = arith.mulf %47, %128 : vector<16x128xf32>
      %130 = arith.addf %6, %129 : vector<16x128xf32>
      scf.yield %130 : vector<16x128xf32>
    }
    %cst_19 = arith.constant 0.00999999977 : f32
    %50 = vector.broadcast %cst_19 : f32 to vector<16x128xf32>
    %51 = arith.mulf %50, %5 : vector<16x128xf32>
    %c0_20 = arith.constant 0 : index
    %c0_21 = arith.constant 0 : index
    %c0_22 = arith.constant 0 : index
    %52 = vector.load %arg3[%c0_20, %c0_21, %c0_22] : memref<1x16x128xf32, #tpu.memory_space<vmem>>, vector<1x16x128xf32>
    %53 = vector.shape_cast %52 : vector<1x16x128xf32> to vector<16x128xf32>
    %54 = arith.mulf %51, %53 : vector<16x128xf32>
    %55 = arith.addf %49, %54 : vector<16x128xf32>
    %c0_23 = arith.constant 0 : index
    %c0_24 = arith.constant 0 : index
    %c0_25 = arith.constant 0 : index
    %56 = vector.load %arg5[%c0_23, %c0_24, %c0_25] : memref<1x16x128xf32, #tpu.memory_space<vmem>>, vector<1x16x128xf32>
    %57 = vector.shape_cast %56 : vector<1x16x128xf32> to vector<16x128xf32>
    %58 = vector.shape_cast %55 : vector<16x128xf32> to vector<1x16x128xf32>
    tpu.vector_store %arg5[%c0_23, %c0_24, %c0_25], %58 {strides = array<i32>} : memref<1x16x128xf32, #tpu.memory_space<vmem>>, vector<1x16x128xf32>,
    return
  }
  func.func @transform_0(%arg0: i32) -> (i32, i32, i32) {
    %c0_i32 = arith.constant 0 : i32
    %c0_i32_0 = arith.constant 0 : i32
    %c0_i32_1 = arith.constant 0 : i32
    return %arg0, %c0_i32, %c0_i32_0 : i32, i32, i32
  }
  func.func @transform_1(%arg0: i32) -> (i32, i32, i32) {
    %c0_i32 = arith.constant 0 : i32
    %c0_i32_0 = arith.constant 0 : i32
    %c0_i32_1 = arith.constant 0 : i32
    return %arg0, %c0_i32, %c0_i32_0 : i32, i32, i32
  }
  func.func @transform_2(%arg0: i32) -> (i32, i32, i32) {
    %c0_i32 = arith.constant 0 : i32
    %c0_i32_0 = arith.constant 0 : i32
    %c0_i32_1 = arith.constant 0 : i32
    return %arg0, %c0_i32, %c0_i32_0 : i32, i32, i32
  }
  func.func @transform_3(%arg0: i32) -> (i32, i32) {
    %c0_i32 = arith.constant 0 : i32
    %c0_i32_0 = arith.constant 0 : i32
    %c0_i32_1 = arith.constant 0 : i32
    return %c0_i32, %c0_i32_0 : i32, i32
  }
  func.func @transform_4(%arg0: i32) -> (i32, i32, i32) {
    %c0_i32 = arith.constant 0 : i32
    %c0_i32_0 = arith.constant 0 : i32
    %c0_i32_1 = arith.constant 0 : i32
    return %arg0, %c0_i32, %c0_i32_0 : i32, i32, i32
  }
}

</mosaic_0001>

<bundles_post_ra>
// kernel: tpu_custom_call.1
= control target key start
LH: loop header
LB: loop body
LE: loop exit
PB: predicated region body
PF: predicated region fallthrough
CT: control target
= control target key end

     0   :  { %9 = vsyncpa [#allocation3], 0  ;;  %s749_s0 = inlined_call_operand.hbm [shape: f32[1,16,128], index: 0, kind: input, shape index: {}]   ;;  %s750_s1 = inlined_call_operand.hbm [shape: f32[1,16,128], index: 1, kind: input, shape index: {}]   ;;  %s751_s2 = inlined_call_operand.hbm [shape: f32[1,16,128], index: 2, kind: input, shape index: {}]   ;;  %s752_s3 = inlined_call_operand.vmem [shape: f32[2,128], index: 3, kind: input, shape index: {}]   ;;  %s753_s4 = inlined_call_operand.hbm [shape: f32[1,16,128], index: 4, kind: output, shape index: {}]  }
   0x1   :  { %10 = vsyncpa [#allocation6], 0 }
   0x2   :  { %11 = vsyncpa [#allocation4], 0  ;;  %s489_s15 = smov [#allocation5]   ;;  %s490_s17 = smov [#allocation2]  }
   0x3   :  { %s29_s16 = sshll.u32 %s489_s15, 4  ;;  %s17_s18 = sshll.u32 %s490_s17, 4  ;;  %s30_s16 = int_to_ptr.vmem [resolvable:$true] %s29_s16  ;;  %s525_s18 = int_to_ptr.vmem [resolvable:$true] %s17_s18 }
   0x4   :  { %s371_s21 = scalar_lea.hbm %s750_s1, 256 }
   0x5   :  { %p372_p0 = scmp.ne.s32.totalorder %s750_s1, %s371_s21  ;;  %p375_p1 = scmp.lt.u32.totalorder %s371_s21, %s750_s1 }
   0x7   :  { %p377_p2 = pnand %p375_p1, %p372_p0 }
   0x9   :  { %380 = shalt.err (!%p377_p2)
}
   0xa   :  { %s381_s26 = scalar_lea.vmem %s30_s16, 256  ;;  %p386_p4 = scmp.lt.s32.totalorder %s30_s16, %s30_s16 }
   0xb   :  { %p382_p3 = scmp.ne.s32.totalorder %s30_s16, %s381_s26  ;;  %p387_p5 = scmp.lt.s32.totalorder %s381_s26, %s381_s26 }
   0xd   :  { %p388_p6 = por %p387_p5, %p386_p4 }
   0xf   :  { %p389_p7 = pnand %p388_p6, %p382_p3 }
  0x11   :  { %392 = shalt.err (!%p389_p7)
}
  0x12   :  { %s491_s27 = smov 128   ;;  %s492_s28 = smov 8  }
  0x13   :  { %35 = dma.hbm_to_vmem [thread:$0]  %s750_s1, 256, %s30_s16, [#allocation6], %s491_s27, %s491_s27, %s492_s28  }
  0x14   :  { %s393_s7 = scalar_lea.hbm %s749_s0, 256 }
  0x15   :  { %p394_p8 = scmp.ne.s32.totalorder %s749_s0, %s393_s7  ;;  %p397_p9 = scmp.lt.u32.totalorder %s393_s7, %s749_s0 }
  0x17   :  { %p399_p10 = pnand %p397_p9, %p394_p8 }
  0x19   :  { %402 = shalt.err (!%p399_p10)
}
  0x1a   :  { %s403_s12 = scalar_lea.vmem %s525_s18, 256  ;;  %p408_p12 = scmp.lt.s32.totalorder %s525_s18, %s525_s18 }
  0x1b   :  { %p404_p11 = scmp.ne.s32.totalorder %s525_s18, %s403_s12  ;;  %p409_p13 = scmp.lt.s32.totalorder %s403_s12, %s403_s12 }
  0x1d   :  { %p410_p0 = por %p409_p13, %p408_p12 }
  0x1f   :  { %p411_p1 = pnand %p410_p0, %p404_p11 }
  0x21   :  { %414 = shalt.err (!%p411_p1)
}
  0x22   :  { %23 = dma.hbm_to_vmem [thread:$0]  %s749_s0, 256, %s525_s18, [#allocation3], %s491_s27, %s491_s27, %s492_s28  }
  0x23   :  { %s493_s14 = smov [#allocation7]   ;;  %s415_s19 = scalar_lea.hbm %s751_s2, 256 }
  0x24   :  { %s41_s15 = sshll.u32 %s493_s14, 4  ;;  %p416_p2 = scmp.ne.s32.totalorder %s751_s2, %s415_s19  ;;  %s42_s15 = int_to_ptr.vmem [resolvable:$true] %s41_s15 }
  0x25   :  { %p419_p3 = scmp.lt.u32.totalorder %s415_s19, %s751_s2 }
  0x27   :  { %p421_p4 = pnand %p419_p3, %p416_p2 }
  0x29   :  { %424 = shalt.err (!%p421_p4)
}
  0x2a   :  { %s425_s24 = scalar_lea.vmem %s42_s15, 256  ;;  %p430_p6 = scmp.lt.s32.totalorder %s42_s15, %s42_s15 }
  0x2b   :  { %p426_p5 = scmp.ne.s32.totalorder %s42_s15, %s425_s24  ;;  %p431_p7 = scmp.lt.s32.totalorder %s425_s24, %s425_s24 }
  0x2d   :  { %p432_p8 = por %p431_p7, %p430_p6 }
  0x2f   :  { %p433_p9 = pnand %p432_p8, %p426_p5 }
  0x31   :  { %436 = shalt.err (!%p433_p9)
}
  0x32   :  { %47 = dma.hbm_to_vmem [thread:$0]  %s751_s2, 256, %s42_s15, [#allocation6], %s491_s27, %s491_s27, %s492_s28  }
  0x33   :  { %471 = dma.done.wait [#allocation3], 256  }
  0x34   :  { %472 = vsyncadd [#allocation3], 4294967040  ;;  %v68_v0 = vlaneseq }
  0x35   :  { %473 = dma.done.wait [#allocation6], 512  }
  0x36   :  { %474 = vsyncadd [#allocation6], 4294966784  ;;  %v577_v1 = vshrl.u32 %v68_v0, 7  ;;  %v494_v3 = vmov 0.0   ;;  %v59_v7 = vld [vmem:[#allocation2] sm:$0xff]  ;;  %v589_v10 = vld [vmem:[#allocation5] sm:$0xff] }
  0x37   :  { %v592_v11 = vmul.f32 %v589_v10, %v59_v7   ;;  %s495_s2 = smov 127   ;;  %s496_s25 = smov 1   ;;  %v60_v13 = vld [vmem:[#allocation2 + $0x8] sm:$0xff]  ;;  %v594_v14 = vld [vmem:[#allocation5 + $0x8] sm:$0xff]  ;;  %v67_v18 = vld [vmem:[%s752_s3] sm:$0x3] }
  0x38   :  { %vm79_vm0 = vcmp.gt.s32.totalorder %v577_v1, 0  ;;  %vm87_vm1 = vcmp.lt.s32.totalorder %v577_v1, 1  ;;  %vm90_vm2 = vcmp.lt.s32.totalorder %v577_v1, 7  ;;  %v78_v2 = vadd.s32 8, %v577_v1  ;;  %s628_s3 = smov 0  }
  0x39   :  { %v583_v4 = vsel %vm79_vm0, 0.083333336, %v494_v3  ;;  %v597_v15 = vmul.f32 %v594_v14, %v60_v13   ;;  %v74_v16 = vsub.s32 1, %v577_v1  ;;  %v70_v17 = vsub.s32 0, %v577_v1 }
  0x3a   :  { %v93_v5 = vadd.f32 0.083333336, %v583_v4  ;;  %vm84_vm3 = vcmp.lt.s32.totalorder %v78_v2, 15  ;;  %v63_v37 = vsub.f32 1.0, %v589_v10  ;;  %v64_v43 = vsub.f32 1.0, %v594_v14 }
  0x3b   :  { %v586_v6 = vsel %vm84_vm3, 0.083333336, %v494_v3  ;;  %v604_v19 = vrot.slane %v67_v18, %v74_v16  ;;  %v606_v20 = vrot.slane %v67_v18, %v70_v17  ;;  %v754_v47 = vmov %v597_v15 }
  0x3c   :  { %v95_v8 = vadd.f32 0.16666667, %v93_v5  ;;  %v94_v9 = vadd.f32 0.083333336, %v586_v6  ;;  %v111_v23 = vmul.f32 2.0, %v93_v5  ;;  %v755_v48 = vmov %v592_v11 }
  0x3e   :  { %103 = vrot.lane.b32.xlu1 %v95_v8, %s495_s2  ;;  %97 = vrot.lane.b32.xlu0 %v95_v8, %s496_s25  ;;  %v96_v12 = vadd.f32 0.16666667, %v94_v9  ;;  %v112_v31 = vmul.f32 2.0, %v94_v9 }
  0x42   :  { %105 = vrot.lane.b32.xlu1 %v96_v12, %s495_s2  ;;  %99 = vrot.lane.b32.xlu0 %v96_v12, %s496_s25 }
  0xb0   :  { %v104_v21 = vpop.permute.xlu1 %103  ;;  %v98_v22 = vpop.permute.xlu0 %97 }
  0xb1   :  { %v107_v24 = vmul.f32 %v104_v21, %v604_v19  ;;  %v101_v25 = vmul.f32 %v98_v22, %v606_v20 }
  0xb3   :  { %v109_v26 = vadd.f32 %v107_v24, %v101_v25 }
  0xb4   :  { %v106_v27 = vpop.permute.xlu1 %105  ;;  %v100_v28 = vpop.permute.xlu0 %99 }
  0xb5   :  { %v113_v29 = vadd.f32 %v111_v23, %v109_v26  ;;  %v108_v30 = vmul.f32 %v106_v27, %v604_v19  ;;  %v102_v32 = vmul.f32 %v100_v28, %v606_v20 }
  0xb7   :  { %367 = vrcp.f32 %v113_v29  ;;  %v110_v33 = vadd.f32 %v108_v30, %v102_v32 }
  0xb9   :  { %v114_v34 = vadd.f32 %v112_v31, %v110_v33 }
  0xbb   :  { %369 = vrcp.f32 %v114_v34 }
  0xc1   :  { %v368_v35 = vpop.eup %367 }
  0xc2   :  { %v117_v36 = vmul.f32 %v368_v35, %v113_v29 }
  0xc4   :  { %v119_v38 = vsub.f32 2.0, %v117_v36 }
  0xc5   :  { %v370_v39 = vpop.eup %369 }
  0xc6   :  { %v121_v40 = vmul.f32 %v368_v35, %v119_v38  ;;  %v118_v41 = vmul.f32 %v370_v39, %v114_v34 }
  0xc8   :  { %v615_v42 = vmul.f32 %v121_v40, %v63_v37  ;;  %v120_v44 = vsub.f32 2.0, %v118_v41 }
  0xca   :  { %v122_v45 = vmul.f32 %v370_v39, %v120_v44 }
  0xcc   :  { %v620_v46 = vmul.f32 %v122_v45, %v64_v43 }
  0xcd LB: > { %v133_v49 = vrot.slane %v483_v48, 7  ;;  %v134_v50 = vrot.slane %v479_v47, 7  ;;  %v139_v51 = vrot.slane %v483_v48, 1  ;;  %v140_v52 = vrot.slane %v479_v47, 1  ;;  %s497_s30 = smov 127   ;;  %s498_s5 = smov 1   ;;  %s487_s3 = sphi %s628_s3, %s130_s3   ;;  %v483_v48 = vphi %v755_v48, %v757_v48   ;;  %v479_v47 = vphi %v754_v47, %v756_v47  }
  0xce   : > { %v147_v53 = vmul.f32 0.16666667, %v483_v48  ;;  %v148_v0 = vmul.f32 0.16666667, %v479_v47  ;;  %s130_s3 = sadd.s32 1, %s487_s3  }
  0xcf   : > { %v136_v54 = vsel %vm87_vm1, %v134_v50, %v133_v49  ;;  %v141_v55 = vsel %vm90_vm2, %v139_v51, %v140_v52  ;;  %v135_v56 = vsel %vm87_vm1, %v133_v49, %v134_v50  ;;  %v142_v57 = vsel %vm90_vm2, %v140_v52, %v139_v51  ;;  %p127_p10 = scmp.ge.s32.totalorder %s130_s3, 128  }
  0xd0   : > { %v137_v58 = vmul.f32 %v136_v54, %v583_v4  ;;  %v143_v59 = vmul.f32 0.083333336, %v141_v55  ;;  %v138_v60 = vmul.f32 0.083333336, %v135_v56  ;;  %v144_v61 = vmul.f32 %v142_v57, %v586_v6  ;;  %s499_s6 = smov (%p127_p10), [#allocation8]  }
  0xd1   :  { %s308_s7 = sshll.u32 (%p127_p10), %s499_s6, 4  ;;  %s309_s7 = int_to_ptr.vmem [resolvable:$true] %s308_s7 }
  0xd2   : > { %v145_v62 = vadd.f32 %v143_v59, %v137_v58  ;;  %v146_v63 = vadd.f32 %v144_v61, %v138_v60  ;;  %s437_s8 = scalar_lea.vmem (%p127_p10), %s309_s7, 256  ;;  %p442_p12 = scmp.lt.s32.totalorder (%p127_p10), %s309_s7, %s309_s7 }
  0xd3   :  { %p438_p11 = scmp.ne.s32.totalorder (%p127_p10), %s309_s7, %s437_s8  ;;  %p443_p13 = scmp.lt.s32.totalorder (%p127_p10), %s437_s8, %s437_s8 }
  0xd4   : > { %v149_v2 = vadd.f32 %v147_v53, %v145_v62  ;;  %v150_v3 = vadd.f32 %v148_v0, %v146_v63  ;;  %v165_v8 = vmul.f32 2.0, %v145_v62  ;;  %v166_v22 = vmul.f32 2.0, %v146_v63 }
  0xd5   :  { %p444_p0 = por (%p127_p10), %p443_p13, %p442_p12 }
  0xd6   : > { %157 = vrot.lane.b32.xlu1 %v149_v2, %s497_s30  ;;  %151 = vrot.lane.b32.xlu0 %v149_v2, %s498_s5 }
  0xd7   :  { %p445_p1 = pnand (%p127_p10), %p444_p0, %p438_p11 }
  0xda   : > { %159 = vrot.lane.b32.xlu1 %v150_v3, %s497_s30  ;;  %153 = vrot.lane.b32.xlu0 %v150_v3, %s498_s5 }
 0x148   : > { %v158_v5 = vpop.permute.xlu1 %157  ;;  %v152_v7 = vpop.permute.xlu0 %151 }
 0x149   : > { %v161_v9 = vmul.f32 %v158_v5, %v604_v19  ;;  %v155_v12 = vmul.f32 %v152_v7, %v606_v20 }
 0x14b   : > { %v163_v13 = vadd.f32 %v161_v9, %v155_v12 }
 0x14c   : > { %v160_v16 = vpop.permute.xlu1 %159  ;;  %v154_v17 = vpop.permute.xlu0 %153 }
 0x14d   : > { %v167_v18 = vadd.f32 %v165_v8, %v163_v13  ;;  %v162_v21 = vmul.f32 %v160_v16, %v604_v19  ;;  %v156_v23 = vmul.f32 %v154_v17, %v606_v20 }
 0x14f   : > { %v169_v24 = vmul.f32 %v167_v18, %v615_v42  ;;  %v164_v25 = vadd.f32 %v162_v21, %v156_v23 }
 0x151   : > { %v168_v26 = vadd.f32 %v166_v22, %v164_v25  ;;  %v171_v27 = vadd.f32 %v169_v24, %v592_v11 }
 0x153   : > { %v170_v28 = vmul.f32 %v168_v26, %v620_v46  ;;  %v173_v30 = vrot.slane %v171_v27, 7  ;;  %v179_v31 = vrot.slane %v171_v27, 1  ;;  %v187_v47 = vmul.f32 0.16666667, %v171_v27 }
 0x155   : > { %v172_v29 = vadd.f32 %v170_v28, %v597_v15 }
 0x157   : > { %v174_v32 = vrot.slane %v172_v29, 7  ;;  %v180_v33 = vrot.slane %v172_v29, 1  ;;  %v188_v49 = vmul.f32 0.16666667, %v172_v29 }
 0x159   : > { %v176_v34 = vsel %vm87_vm1, %v174_v32, %v173_v30  ;;  %v181_v35 = vsel %vm90_vm2, %v179_v31, %v180_v33  ;;  %v175_v36 = vsel %vm87_vm1, %v173_v30, %v174_v32  ;;  %v182_v38 = vsel %vm90_vm2, %v180_v33, %v179_v31 }
 0x15a   : > { %v177_v39 = vmul.f32 %v176_v34, %v583_v4  ;;  %v183_v40 = vmul.f32 0.083333336, %v181_v35  ;;  %v178_v41 = vmul.f32 0.083333336, %v175_v36  ;;  %v184_v44 = vmul.f32 %v182_v38, %v586_v6 }
 0x15c   : > { %v185_v45 = vadd.f32 %v183_v40, %v177_v39  ;;  %v186_v48 = vadd.f32 %v184_v44, %v178_v41 }
 0x15e   : > { %v189_v50 = vadd.f32 %v187_v47, %v185_v45  ;;  %v190_v51 = vadd.f32 %v188_v49, %v186_v48  ;;  %v205_v60 = vmul.f32 2.0, %v185_v45  ;;  %v206_v62 = vmul.f32 2.0, %v186_v48 }
 0x160   : > { %191 = vrot.lane.b32.xlu0 %v189_v50, %s498_s5  ;;  %193 = vrot.lane.b32.xlu1 %v190_v51, %s498_s5 }
 0x164   : > { %197 = vrot.lane.b32.xlu0 %v189_v50, %s497_s30  ;;  %199 = vrot.lane.b32.xlu1 %v190_v51, %s497_s30 }
 0x1d2   : > { %v192_v52 = vpop.permute.xlu0 %191  ;;  %v194_v53 = vpop.permute.xlu1 %193 }
 0x1d3   : > { %v195_v56 = vmul.f32 %v192_v52, %v606_v20  ;;  %v196_v57 = vmul.f32 %v194_v53, %v606_v20 }
 0x1d6   : > { %v198_v54 = vpop.permute.xlu0 %197  ;;  %v200_v55 = vpop.permute.xlu1 %199 }
 0x1d7   : > { %v201_v58 = vmul.f32 %v198_v54, %v604_v19  ;;  %v202_v59 = vmul.f32 %v200_v55, %v604_v19 }
 0x1d9   : > { %v203_v61 = vadd.f32 %v201_v58, %v195_v56  ;;  %v204_v63 = vadd.f32 %v202_v59, %v196_v57 }
 0x1db   : > { %v207_v0 = vadd.f32 %v205_v60, %v203_v61  ;;  %v208_v2 = vadd.f32 %v206_v62, %v204_v63 }
 0x1dd   : > { %v209_v3 = vmul.f32 %v207_v0, %v615_v42  ;;  %v210_v5 = vmul.f32 %v208_v2, %v620_v46 }
 0x1df   : > { %v211_v7 = vadd.f32 %v209_v3, %v592_v11  ;;  %v212_v8 = vadd.f32 %v210_v5, %v597_v15 }
 0x1e1   : > { %v213_v9 = vrot.slane %v211_v7, 7  ;;  %v219_v12 = vrot.slane %v211_v7, 1  ;;  %v214_v13 = vrot.slane %v212_v8, 7  ;;  %v220_v16 = vrot.slane %v212_v8, 1 }
 0x1e2   : > { %v227_v28 = vmul.f32 0.16666667, %v211_v7  ;;  %v228_v30 = vmul.f32 0.16666667, %v212_v8 }
 0x1e3   : > { %v216_v17 = vsel %vm87_vm1, %v214_v13, %v213_v9  ;;  %v221_v18 = vsel %vm90_vm2, %v219_v12, %v220_v16  ;;  %v215_v21 = vsel %vm87_vm1, %v213_v9, %v214_v13  ;;  %v222_v22 = vsel %vm90_vm2, %v220_v16, %v219_v12 }
 0x1e4   : > { %v217_v23 = vmul.f32 %v216_v17, %v583_v4  ;;  %v223_v24 = vmul.f32 0.083333336, %v221_v18  ;;  %v218_v25 = vmul.f32 0.083333336, %v215_v21  ;;  %v224_v26 = vmul.f32 %v222_v22, %v586_v6 }
 0x1e6   : > { %v225_v27 = vadd.f32 %v223_v24, %v217_v23  ;;  %v226_v29 = vadd.f32 %v224_v26, %v218_v25 }
 0x1e8   : > { %v229_v31 = vadd.f32 %v227_v28, %v225_v27  ;;  %v230_v32 = vadd.f32 %v228_v30, %v226_v29  ;;  %v245_v44 = vmul.f32 2.0, %v225_v27  ;;  %v246_v47 = vmul.f32 2.0, %v226_v29 }
 0x1ea   : > { %231 = vrot.lane.b32.xlu0 %v229_v31, %s498_s5  ;;  %233 = vrot.lane.b32.xlu1 %v230_v32, %s498_s5 }
 0x1ee   : > { %237 = vrot.lane.b32.xlu0 %v229_v31, %s497_s30  ;;  %239 = vrot.lane.b32.xlu1 %v230_v32, %s497_s30 }
 0x25c   : > { %v232_v33 = vpop.permute.xlu0 %231  ;;  %v234_v34 = vpop.permute.xlu1 %233 }
 0x25d   : > { %v235_v38 = vmul.f32 %v232_v33, %v606_v20  ;;  %v236_v39 = vmul.f32 %v234_v34, %v606_v20 }
 0x260   : > { %v238_v35 = vpop.permute.xlu0 %237  ;;  %v240_v36 = vpop.permute.xlu1 %239 }
 0x261   : > { %v241_v40 = vmul.f32 %v238_v35, %v604_v19  ;;  %v242_v41 = vmul.f32 %v240_v36, %v604_v19  ;;  %v293_v36 = vmul.f32 (%p127_p10), 0.01, %v63_v37 }
 0x263   : > { %v243_v45 = vadd.f32 %v241_v40, %v235_v38  ;;  %v244_v48 = vadd.f32 %v242_v41, %v236_v39  ;;  %v295_v38 = vld [vmem:[#allocation7] sm:$0xff] (%p127_p10)  ;;  %v294_v39 = vmul.f32 (%p127_p10), 0.01, %v64_v43  ;;  %v296_v40 = vld [vmem:[#allocation7 + $0x8] sm:$0xff] (%p127_p10) }
 0x264   :  { %v297_v41 = vmul.f32 (%p127_p10), %v295_v38, %v293_v36 }
 0x265   : > { %v247_v49 = vadd.f32 %v245_v44, %v243_v45  ;;  %v248_v50 = vadd.f32 %v246_v47, %v244_v48  ;;  %v298_v44 = vmul.f32 (%p127_p10), %v296_v40, %v294_v39 }
 0x267   : > { %v249_v51 = vmul.f32 %v247_v49, %v615_v42  ;;  %v250_v52 = vmul.f32 %v248_v50, %v620_v46 }
 0x269   : > { %v251_v53 = vadd.f32 %v249_v51, %v592_v11  ;;  %v252_v54 = vadd.f32 %v250_v52, %v597_v15 }
 0x26b   : > { %v253_v55 = vrot.slane %v251_v53, 7  ;;  %v259_v56 = vrot.slane %v251_v53, 1  ;;  %v254_v57 = vrot.slane %v252_v54, 7  ;;  %v260_v58 = vrot.slane %v252_v54, 1 }
 0x26c   : > { %v267_v7 = vmul.f32 0.16666667, %v251_v53  ;;  %v268_v9 = vmul.f32 0.16666667, %v252_v54 }
 0x26d   : > { %v256_v59 = vsel %vm87_vm1, %v254_v57, %v253_v55  ;;  %v261_v60 = vsel %vm90_vm2, %v259_v56, %v260_v58  ;;  %v255_v61 = vsel %vm87_vm1, %v253_v55, %v254_v57  ;;  %v262_v62 = vsel %vm90_vm2, %v260_v58, %v259_v56 }
 0x26e   : > { %v257_v63 = vmul.f32 %v256_v59, %v583_v4  ;;  %v263_v0 = vmul.f32 0.083333336, %v261_v60  ;;  %v258_v2 = vmul.f32 0.083333336, %v255_v61  ;;  %v264_v3 = vmul.f32 %v262_v62, %v586_v6 }
 0x270   : > { %v265_v5 = vadd.f32 %v263_v0, %v257_v63  ;;  %v266_v8 = vadd.f32 %v264_v3, %v258_v2 }
 0x272   : > { %v269_v12 = vadd.f32 %v267_v7, %v265_v5  ;;  %v270_v13 = vadd.f32 %v268_v9, %v266_v8  ;;  %v285_v26 = vmul.f32 2.0, %v265_v5  ;;  %v286_v28 = vmul.f32 2.0, %v266_v8 }
 0x274   : > { %271 = vrot.lane.b32.xlu0 %v269_v12, %s498_s5  ;;  %273 = vrot.lane.b32.xlu1 %v270_v13, %s498_s5 }
 0x278   : > { %277 = vrot.lane.b32.xlu0 %v269_v12, %s497_s30  ;;  %279 = vrot.lane.b32.xlu1 %v270_v13, %s497_s30 }
 0x2e6   : > { %v272_v16 = vpop.permute.xlu0 %271  ;;  %v274_v17 = vpop.permute.xlu1 %273 }
 0x2e7   : > { %v275_v22 = vmul.f32 %v272_v16, %v606_v20  ;;  %v276_v23 = vmul.f32 %v274_v17, %v606_v20 }
 0x2ea   : > { %v278_v18 = vpop.permute.xlu0 %277  ;;  %v280_v21 = vpop.permute.xlu1 %279 }
 0x2eb   : > { %v281_v24 = vmul.f32 %v278_v18, %v604_v19  ;;  %v282_v25 = vmul.f32 %v280_v21, %v604_v19 }
 0x2ed   : > { %v283_v27 = vadd.f32 %v281_v24, %v275_v22  ;;  %v284_v29 = vadd.f32 %v282_v25, %v276_v23 }
 0x2ef   : > { %v287_v30 = vadd.f32 %v285_v26, %v283_v27  ;;  %v288_v31 = vadd.f32 %v286_v28, %v284_v29  ;;  %129 = sbr.rel (!%p127_p10) target bundleno = 205 (0xcd), region = 55 }
 0x2f1   : > { %v289_v32 = vmul.f32 %v287_v30, %v615_v42  ;;  %v290_v33 = vmul.f32 %v288_v31, %v620_v46 }
 0x2f3   : > { %v291_v34 = vadd.f32 %v289_v32, %v592_v11   ;;  %v292_v35 = vadd.f32 %v290_v33, %v597_v15  }
 0x2f5   : > { %v756_v47 = vmov %v292_v35  ;;  %v757_v48 = vmov %v291_v34  ;;  %v299_v45 = vadd.f32 (%p127_p10), %v297_v41, %v291_v34 }
 0x2f6   :  { %v300_v48 = vadd.f32 %v298_v44, %v292_v35 }
 0x2f7   :  { %301 = vst [vmem:[#allocation8] sm:$0xff] %v299_v45 }
 0x2f8   :  { %302 = vst [vmem:[#allocation8 + $0x8] sm:$0xff] %v300_v48 }
 0x2f9   :  { %448 = shalt.err (!%p445_p1)
}
 0x2fa   :  { %s449_s11 = scalar_lea.hbm %s753_s4, 256 }
 0x2fb   :  { %p450_p2 = scmp.ne.s32.totalorder %s753_s4, %s449_s11  ;;  %p453_p3 = scmp.lt.u32.totalorder %s449_s11, %s753_s4 }
 0x2fd   :  { %p455_p4 = pnand %p453_p3, %p450_p2 }
 0x2ff   :  { %458 = shalt.err (!%p455_p4)
}
 0x300   :  { %314 = dma.vmem_to_hbm [thread:$0]  %s309_s7, 256, %s753_s4, [#allocation4], %s491_s27, %s491_s27, %s492_s28  }
 0x301   :  { %475 = dma.done.wait [#allocation4], 256  }
 0x302   :  { %476 = vsyncadd [#allocation4], 4294967040 }
 0x303   :  { %318 = vsyncpa [#allocation3], 1 }
 0x304   :  { %319 = vsyncpa [#allocation6], 1 }
 0x305   :  { %320 = vsyncpa [#allocation4], 1 }

</bundles_post_ra>
